<compile_context>
chip_gen: v7x
topology: tpu7x:2x2x1
jax: 0.10.0
libtpu: 0.0.40
codegen_flags: <defaults>
</compile_context>

<pallas_src>
import functools

import jax
import jax.numpy as jnp
from jax.experimental import pallas as pl
from jax.experimental.pallas import tpu as pltpu


def _vmem_capacity_bytes() -> int:
    """Physical VMEM per core; conservative fallback if the query fails."""
    try:
        return int(pltpu.get_tpu_info().vmem_capacity_bytes)
    except Exception:
        return 64 << 20


def _is_pre_v6() -> bool:
    """True on v5e and older (no bf16 VPU/EUP)."""
    try:
        kind = jax.devices()[0].device_kind.lower()
    except Exception:
        return True
    return any(tag in kind for tag in ("v2", "v3", "v4", "v5"))


def _choose_tile_n(n: int, c: int, itemsize: int, budget_bytes: int,
                   lane_major: bool) -> int:
    """Rows per tile.  Live VMEM per tile ~= double-buffered input slab plus
    ~4 live (C, TILE_N) f32 temporaries:  C * TILE_N * (2*itemsize + 16)."""
    per_row = max(1, c) * (2 * itemsize + 16)
    tile = max(1, budget_bytes // per_row)
    align = 128 if lane_major else 8          # lane axis vs sublane axis
    if n <= tile:
        return n                              # single full-extent block: always legal
    tile = max(align, (tile // align) * align)
    return min(tile, 32768)                   # keep per-temp vreg loops sane


def _focal_loss_kernel(logits_ref, targets_ref, alpha_ref, out_ref, *,
                       gamma: float, n_total: int, tile_n: int,
                       class_axis: int, exp_dtype):
    i = pl.program_id(0)

    x = logits_ref[...].astype(jnp.float32)   # (C, TN) or (TN, C)
    t = targets_ref[...]                      # (1, TN) or (TN, 1) int32
    a_t = alpha_ref[...].astype(jnp.float32)  # per-row alpha, same shape as t

    # Target-class predicate: one iota + compare, reused for the logit gather.
    cls = jax.lax.broadcasted_iota(jnp.int32, x.shape, class_axis)
    hit = cls == t                            # broadcasts along the class axis

    # Log-softmax gather of the target class; no full softmax materialized.
    m = jnp.max(x, axis=class_axis, keepdims=True)
    e = jnp.exp((x - m).astype(exp_dtype)).astype(jnp.float32)
    log_denom = jnp.log(jnp.sum(e, axis=class_axis, keepdims=True))
    x_t = jnp.sum(jnp.where(hit, x, 0.0), axis=class_axis, keepdims=True)

    log_p = x_t - m - log_denom               # per-row
    p_t = jnp.exp(log_p)
    one_minus_p = 1.0 - p_t

    g = float(gamma)
    if g == int(g) and 0 <= int(g) <= 8:
        gi = int(g)
        if gi == 0:
            focal = jnp.ones_like(one_minus_p)
        else:
            # gamma=2 (default): plain VPU multiplies, keeps the EUP slot free.
            focal = one_minus_p
            for _ in range(gi - 1):
                focal = focal * one_minus_p
    else:
        # General (non-integer) gamma: explicit exp/log1p on the EUP.
        focal = jnp.exp(g * jnp.log1p(-p_t))

    loss = -a_t * focal * log_p               # per-row loss

    # Mask rows past N in a (possibly ragged) last tile.  Select, not multiply,
    # so garbage in the padded region can never poison the result.
    row_axis = 1 - class_axis
    rows = jax.lax.broadcasted_iota(jnp.int32, loss.shape, row_axis) + i * tile_n
    loss = jnp.where(rows < n_total, loss, 0.0)

    out_ref[...] = loss.astype(out_ref.dtype)


def focal_loss(logits, targets, alpha, *, gamma=2.0, size_average=True):
    """logits: (N, C) float (f32 or bf16); targets: (N,) int; alpha: (C,) or (C, 1)."""
    n, c = logits.shape
    targets = targets.astype(jnp.int32)

    # alpha_t = alpha[targets] precomputed once in the wrapper (tiny XLA gather
    # over (C,) + (N,) arrays), removing the in-kernel (TN, C) alpha gather.
    alpha_flat = jnp.asarray(alpha, jnp.float32).reshape(-1)
    alpha_t = alpha_flat[targets]             # (N,)

    in_dtype = logits.dtype
    itemsize = jnp.dtype(in_dtype).itemsize

    # Lane-occupancy fix: small class counts go class-major (batch on lanes).
    transposed = c < 128

    vmem_cap = _vmem_capacity_bytes()
    vmem_limit = min(int(0.75 * vmem_cap), 96 << 20)   # 96 MiB v5e/v6e, 48 MiB v7x
    budget = vmem_limit // 3
    tile_n = _choose_tile_n(n, c, itemsize, budget, lane_major=transposed)
    grid = (pl.cdiv(n, tile_n),)

    # bf16 exp for the softmax denominator only where the EUP is bf16-capable
    # and the caller already accepts reduced precision (bf16 logits).
    use_bf16_exp = (in_dtype == jnp.bfloat16) and not _is_pre_v6()
    exp_dtype = jnp.bfloat16 if use_bf16_exp else jnp.float32

    kernel = functools.partial(
        _focal_loss_kernel,
        gamma=float(gamma),
        n_total=int(n),
        tile_n=int(tile_n),
        class_axis=0 if transposed else 1,
        exp_dtype=exp_dtype,
    )

    cost = pl.CostEstimate(
        flops=8 * n * c,
        transcendentals=n * c + 3 * n,
        bytes_accessed=n * c * itemsize + 12 * n,
    )

    if transposed:
        # Class-major layout: (C, N) with the batch on the 128-lane axis, so
        # every per-element op and every per-row quantity is lane-dense.
        logits_in = jnp.transpose(logits)             # (C, N)
        targets_in = targets.reshape(1, n)
        alpha_in = alpha_t.reshape(1, n)
        in_specs = [
            pl.BlockSpec((c, tile_n), lambda i: (0, i)),   # logits tile (pipelined)
            pl.BlockSpec((1, tile_n), lambda i: (0, i)),   # per-row targets
            pl.BlockSpec((1, tile_n), lambda i: (0, i)),   # per-row alpha
        ]
        out_specs = pl.BlockSpec((1, tile_n), lambda i: (0, i))
        out_shape = jax.ShapeDtypeStruct((1, n), jnp.float32)
    else:
        logits_in = logits
        targets_in = targets.reshape(n, 1)
        alpha_in = alpha_t.reshape(n, 1)
        in_specs = [
            pl.BlockSpec((tile_n, c), lambda i: (i, 0)),
            pl.BlockSpec((tile_n, 1), lambda i: (i, 0)),
            pl.BlockSpec((tile_n, 1), lambda i: (i, 0)),
        ]
        out_specs = pl.BlockSpec((tile_n, 1), lambda i: (i, 0))
        out_shape = jax.ShapeDtypeStruct((n, 1), jnp.float32)

    per_row = pl.pallas_call(
        kernel,
        out_shape=out_shape,
        grid=grid,
        in_specs=in_specs,
        out_specs=out_specs,
        compiler_params=pltpu.CompilerParams(
            # Fully independent row tiles: "parallel" lets v7x shard the
            # stream across both TensorCores.  Single-TC chips are unaffected.
            dimension_semantics=("parallel",),
            vmem_limit_bytes=int(vmem_limit),
        ),
        cost_estimate=cost,
    )(logits_in, targets_in, alpha_in)

    total = jnp.sum(per_row.reshape(-1))
    return total / float(n) if size_average else total


def focal_loss_reference(logits, targets, alpha, *, gamma=2.0, size_average=True):
    p = jax.nn.softmax(logits.astype(jnp.float32), axis=1)
    n, c = logits.shape
    mask = jax.nn.one_hot(targets, c, dtype=jnp.float32)
    probs = jnp.sum(p * mask, axis=1)
    alpha_t = jnp.asarray(alpha, jnp.float32).reshape(-1)[targets]
    batch_loss = -alpha_t * jnp.power(1.0 - probs, gamma) * jnp.log(probs)
    return jnp.mean(batch_loss) if size_average else jnp.sum(batch_loss)


if __name__ == "__main__":
    key = jax.random.PRNGKey(0)
    k1, k2, k3, k4 = jax.random.split(key, 4)

    # Case 1: small class count -> class-major (lane-dense) path, default
    # alpha=ones(C,1), gamma=2, size_average=True (FocalLoss defaults).
    N1, C1 = 8, 16
    logits1 = jax.random.normal(k1, (N1, C1), dtype=jnp.float32)
    targets1 = jax.random.randint(k2, (N1,), 0, C1, dtype=jnp.int32)
    alpha1 = jnp.ones((C1, 1), dtype=jnp.float32)

    loss1 = jax.block_until_ready(focal_loss(logits1, targets1, alpha1,
                                             gamma=2.0, size_average=True))
    ref1 = focal_loss_reference(logits1, targets1, alpha1,
                                gamma=2.0, size_average=True)
    assert jnp.isfinite(loss1), "non-finite loss (case 1)"
    assert jnp.allclose(loss1, ref1, rtol=1e-5, atol=1e-5), (loss1, ref1)

    # Case 2: C >= 128 -> row-major path, non-uniform alpha, sum reduction.
    N2, C2 = 16, 256
    logits2 = jax.random.normal(k3, (N2, C2), dtype=jnp.float32)
    targets2 = jax.random.randint(k4, (N2,), 0, C2, dtype=jnp.int32)
    alpha2 = jnp.linspace(0.5, 1.5, C2, dtype=jnp.float32).reshape(C2, 1)

    loss2 = jax.block_until_ready(focal_loss(logits2, targets2, alpha2,
                                             gamma=2.0, size_average=False))
    ref2 = focal_loss_reference(logits2, targets2, alpha2,
                                gamma=2.0, size_average=False)
    assert jnp.isfinite(loss2), "non-finite loss (case 2)"
    assert jnp.allclose(loss2, ref2, rtol=1e-5, atol=1e-5), (loss2, ref2)

    # Case 3: bf16 logits (halved HBM bytes; bf16 exp engages on v6e/v7x only,
    # hence the looser tolerance).
    logits3 = logits1.astype(jnp.bfloat16)
    loss3 = jax.block_until_ready(focal_loss(logits3, targets1, alpha1,
                                             gamma=2.0, size_average=True))
    ref3 = focal_loss_reference(logits3, targets1, alpha1,
                                gamma=2.0, size_average=True)
    assert jnp.isfinite(loss3), "non-finite loss (case 3)"
    assert jnp.allclose(loss3, ref3, rtol=2e-2, atol=2e-2), (loss3, ref3)

    print("KERNEL_OK")
</pallas_src>

<mosaic_0001>
module attributes {stable_mosaic.version = 11 : i64} {
  func.func @_focal_loss_kernel(%arg0: i32, %arg1: memref<16x8xf32, #tpu.memory_space<vmem>>, %arg2: memref<1x8xi32, #tpu.memory_space<vmem>>, %arg3: memref<1x8xf32, #tpu.memory_space<vmem>>, %arg4: memref<1x8xf32, #tpu.memory_space<vmem>>) attributes {dimension_semantics = [#tpu.dimension_semantics<parallel>], iteration_bounds = array<i64: 1>, scalar_prefetch = 0 : i64, scratch_operands = 0 : i64, tpu.core_type = #tpu.core_type<tc>, window_params = [{transform_indices = @transform_0, window_bounds = array<i64: 16, 8>}, {transform_indices = @transform_1, window_bounds = array<i64: 1, 8>}, {transform_indices = @transform_2, window_bounds = array<i64: 1, 8>}, {transform_indices = @transform_3, window_bounds = array<i64: 1, 8>}]} {
    %c0 = arith.constant 0 : index
    %c0_0 = arith.constant 0 : index
    %0 = vector.load %arg1[%c0, %c0_0] : memref<16x8xf32, #tpu.memory_space<vmem>>, vector<16x8xf32>
    %c0_1 = arith.constant 0 : index
    %c0_2 = arith.constant 0 : index
    %1 = vector.load %arg2[%c0_1, %c0_2] : memref<1x8xi32, #tpu.memory_space<vmem>>, vector<1x8xi32>
    %c0_3 = arith.constant 0 : index
    %c0_4 = arith.constant 0 : index
    %2 = vector.load %arg3[%c0_3, %c0_4] : memref<1x8xf32, #tpu.memory_space<vmem>>, vector<1x8xf32>
    %3 = tpu.iota {dimensions = array<i32: 0>} : vector<16x8xi32>
    %4 = vector.broadcast %1 : vector<1x8xi32> to vector<16x8xi32>
    %5 = arith.cmpi eq, %3, %4 : vector<16x8xi32>
    %cst = arith.constant dense<0xFF800000> : vector<8xf32>
    %6 = vector.multi_reduction <maximumf>, %0, %cst [0] : vector<16x8xf32> to vector<8xf32>
    %7 = vector.shape_cast %6 : vector<8xf32> to vector<1x8xf32>
    %8 = vector.broadcast %7 : vector<1x8xf32> to vector<16x8xf32>
    %9 = arith.subf %0, %8 : vector<16x8xf32>
    %10 = math.exp %9 : vector<16x8xf32>
    %cst_5 = arith.constant dense<0.000000e+00> : vector<8xf32>
    %11 = vector.multi_reduction <add>, %10, %cst_5 [0] : vector<16x8xf32> to vector<8xf32>
    %12 = vector.shape_cast %11 : vector<8xf32> to vector<1x8xf32>
    %13 = math.log %12 : vector<1x8xf32>
    %cst_6 = arith.constant 0.000000e+00 : f32
    %14 = vector.broadcast %cst_6 : f32 to vector<16x8xf32>
    %15 = arith.select %5, %0, %14 : vector<16x8xi1>, vector<16x8xf32>
    %cst_7 = arith.constant dense<0.000000e+00> : vector<8xf32>
    %16 = vector.multi_reduction <add>, %15, %cst_7 [0] : vector<16x8xf32> to vector<8xf32>
    %17 = vector.shape_cast %16 : vector<8xf32> to vector<1x8xf32>
    %18 = arith.subf %17, %7 : vector<1x8xf32>
    %19 = arith.subf %18, %13 : vector<1x8xf32>
    %20 = math.exp %19 : vector<1x8xf32>
    %cst_8 = arith.constant 1.000000e+00 : f32
    %21 = vector.broadcast %cst_8 : f32 to vector<1x8xf32>
    %22 = arith.subf %21, %20 : vector<1x8xf32>
    %23 = arith.mulf %22, %22 : vector<1x8xf32>
    %cst_9 = arith.constant 0.000000e+00 : f32
    %24 = vector.broadcast %cst_9 : f32 to vector<1x8xf32>
    %25 = arith.subf %24, %2 : vector<1x8xf32>
    %26 = arith.mulf %25, %23 : vector<1x8xf32>
    %27 = arith.mulf %26, %19 : vector<1x8xf32>
    %28 = tpu.iota {dimensions = array<i32: 1>} : vector<1x8xi32>
    %c8_i32 = arith.constant 8 : i32
    %29 = arith.muli %arg0, %c8_i32 : i32
    %30 = vector.broadcast %29 : i32 to vector<1x8xi32>
    %31 = arith.addi %28, %30 : vector<1x8xi32>
    %c8_i32_10 = arith.constant 8 : i32
    %32 = vector.broadcast %c8_i32_10 : i32 to vector<1x8xi32>
    %33 = arith.cmpi slt, %31, %32 : vector<1x8xi32>
    %cst_11 = arith.constant 0.000000e+00 : f32
    %34 = vector.broadcast %cst_11 : f32 to vector<1x8xf32>
    %35 = arith.select %33, %27, %34 : vector<1x8xi1>, vector<1x8xf32>
    %c0_12 = arith.constant 0 : index
    %c0_13 = arith.constant 0 : index
    %36 = vector.load %arg4[%c0_12, %c0_13] : memref<1x8xf32, #tpu.memory_space<vmem>>, vector<1x8xf32>
    tpu.vector_store %arg4[%c0_12, %c0_13], %35 {strides = array<i32>} : memref<1x8xf32, #tpu.memory_space<vmem>>, vector<1x8xf32>,
    return
  }
  func.func @transform_0(%arg0: i32) -> (i32, i32) {
    %c0_i32 = arith.constant 0 : i32
    %c0_i32_0 = arith.constant 0 : i32
    return %c0_i32, %arg0 : i32, i32
  }
  func.func @transform_1(%arg0: i32) -> (i32, i32) {
    %c0_i32 = arith.constant 0 : i32
    %c0_i32_0 = arith.constant 0 : i32
    return %c0_i32, %arg0 : i32, i32
  }
  func.func @transform_2(%arg0: i32) -> (i32, i32) {
    %c0_i32 = arith.constant 0 : i32
    %c0_i32_0 = arith.constant 0 : i32
    return %c0_i32, %arg0 : i32, i32
  }
  func.func @transform_3(%arg0: i32) -> (i32, i32) {
    %c0_i32 = arith.constant 0 : i32
    %c0_i32_0 = arith.constant 0 : i32
    return %c0_i32, %arg0 : i32, i32
  }
}

</mosaic_0001>

<bundles_post_ra>
// kernel: tpu_custom_call.1
= control target key start
LH: loop header
LB: loop body
LE: loop exit
PB: predicated region body
PF: predicated region fallthrough
CT: control target
= control target key end

     0   :  { %vm28_vm0 = vcmask 64512   ;;  %s183_s0 = inlined_call_operand.vmem [shape: f32[16,8], index: 0, kind: input, shape index: {}]   ;;  %s184_s1 = inlined_call_operand.vmem [shape: s32[1,8], index: 1, kind: input, shape index: {}]   ;;  %s185_s2 = inlined_call_operand.vmem [shape: f32[1,8], index: 2, kind: input, shape index: {}]   ;;  %s186_s3 = inlined_call_operand.hbm [shape: f32[1,8], index: 3, kind: output, shape index: {}]  }
   0x1   :  { %v15_v0 = vld [vmem:[%s183_s0] sm:$0xff]  ;;  %v16_v1 = vld [vmem:[%s183_s0 + $0x8] sm:$0xff] }
   0x2   :  { %v29_v2 = vsel %vm28_vm0, %v15_v0, -inf  ;;  %v30_v3 = vsel %vm28_vm0, %v16_v1, -inf }
   0x3   :  { %8 = vsyncpa [#allocation3], 0  ;;  %v31_v4 = vmax.f32 %v29_v2, %v30_v3  ;;  %v19_v7 = vlaneseq  ;;  %v98_v14 = vld [vmem:[%s184_s1] ss:$0 sm:$0xff]  ;;  %s132_s18 = smov [#allocation2]   ;;  %vm82_vm4 = vcmask 57344  }
   0x4   :  { %v18_v46 = vld [vmem:[%s185_s2] sm:$0x1]  ;;  %s90_s19 = sshll.u32 %s132_s18, 4  ;;  %s91_s19 = int_to_ptr.vmem [resolvable:$true] %s90_s19 }
   0x5   :  { %v32_v5 = vrot.slane %v31_v4, 4  ;;  %v20_v10 = vshrl.u32 %v19_v7, 7  ;;  %v72_v49 = vsub.f32 0.0, %v18_v46  ;;  %v76_v50 = vand.u32 127, %v19_v7  ;;  %s108_s20 = scalar_lea.vmem %s91_s19, 16  ;;  %s112_s21 = scalar_lea.vmem %s91_s19, 32 }
   0x6   :  { %p109_p0 = scmp.ne.s32.totalorder %s91_s19, %s108_s20  ;;  %p113_p1 = scmp.lt.s32.totalorder %s91_s19, %s91_s19 }
   0x7   :  { %v33_v6 = vmax.f32 %v31_v4, %v32_v5  ;;  %v21_v13 = vadd.s32 8, %v20_v10  ;;  %vm26_vm1 = vcmp.eq.s32.totalorder %v20_v10, %v98_v14  ;;  %vm80_vm3 = vcmp.lt.s32.totalorder %v76_v50, 8  ;;  %p114_p2 = scmp.lt.s32.totalorder %s112_s21, %s108_s20 }
   0x8   :  { %v55_v19 = vsel %vm26_vm1, %v15_v0, 0.0 }
   0x9   :  { %v34_v8 = vrot.slane %v33_v6, 2  ;;  %vm27_vm2 = vcmp.eq.s32.totalorder %v21_v13, %v98_v14  ;;  %v57_v21 = vsel %vm28_vm0, %v55_v19, 0.0  ;;  %p115_p3 = por %p114_p2, %p113_p1 }
   0xa   :  { %v56_v20 = vsel %vm27_vm2, %v16_v1, 0.0 }
   0xb   :  { %v35_v9 = vmax.f32 %v33_v6, %v34_v8  ;;  %v58_v22 = vsel %vm28_vm0, %v56_v20, 0.0  ;;  %p116_p4 = pnand %p115_p3, %p109_p0 }
   0xc   :  { %v59_v23 = vadd.f32 %v58_v22, %v57_v21 }
   0xd   :  { %v36_v11 = vrot.slane %v35_v9, 1 }
   0xe   :  { %v60_v28 = vrot.slane %v59_v23, 4 }
   0xf   :  { %v37_v12 = vmax.f32 %v35_v9, %v36_v11 }
  0x10   :  { %v61_v31 = vadd.f32 %v60_v28, %v59_v23 }
  0x11   :  { %v38_v15 = vsub.f32 %v15_v0, %v37_v12  ;;  %v39_v16 = vsub.f32 %v16_v1, %v37_v12 }
  0x12   :  { %v62_v34 = vrot.slane %v61_v31, 2 }
  0x13   :  { %v40_v17 = vmul.f32 1.442695, %v38_v15  ;;  %v42_v18 = vmul.f32 1.442695, %v39_v16 }
  0x14   :  { %v63_v37 = vadd.f32 %v62_v34, %v61_v31 }
  0x15   :  { %100 = vpow2.f32 %v40_v17 }
  0x16   :  { %102 = vpow2.f32 %v42_v18  ;;  %v64_v39 = vrot.slane %v63_v37, 1 }
  0x18   :  { %v65_v40 = vadd.f32 %v64_v39, %v63_v37 }
  0x1a   :  { %v66_v41 = vsub.f32 %v65_v40, %v37_v12 }
  0x1f   :  { %v101_v24 = vpop.eup %100 }
  0x20   :  { %v103_v25 = vpop.eup %102  ;;  %v44_v26 = vsel %vm28_vm0, %v101_v24, 0.0 }
  0x21   :  { %v45_v27 = vsel %vm28_vm0, %v103_v25, 0.0 }
  0x22   :  { %v46_v29 = vadd.f32 %v45_v27, %v44_v26 }
  0x24   :  { %v47_v30 = vrot.slane %v46_v29, 4 }
  0x26   :  { %v48_v32 = vadd.f32 %v47_v30, %v46_v29 }
  0x28   :  { %v49_v33 = vrot.slane %v48_v32, 2 }
  0x2a   :  { %v50_v35 = vadd.f32 %v49_v33, %v48_v32 }
  0x2c   :  { %v51_v36 = vrot.slane %v50_v35, 1 }
  0x2e   :  { %v52_v38 = vadd.f32 %v51_v36, %v50_v35 }
  0x30   :  { %104 = vlog2.f32 %v52_v38 }
  0x3a   :  { %v105_v42 = vpop.eup %104 }
  0x3b   :  { %v54_v43 = vmul.f32 0.6931472, %v105_v42 }
  0x3d   :  { %v67_v44 = vsub.f32 %v66_v41, %v54_v43 }
  0x3f   :  { %v68_v45 = vmul.f32 1.442695, %v67_v44 }
  0x41   :  { %106 = vpow2.f32 %v68_v45 }
  0x4b   :  { %v107_v47 = vpop.eup %106 }
  0x4c   :  { %v70_v48 = vsub.f32 1.0, %v107_v47 }
  0x4e   :  { %v71_v51 = vmul.f32 %v70_v48, %v70_v48 }
  0x50   :  { %v73_v52 = vmul.f32 %v72_v49, %v71_v51 }
  0x52   :  { %v74_v53 = vmul.f32 %v73_v52, %v67_v44 }
  0x54   :  { %v81_v54 = vsel %vm80_vm3, %v74_v53, 0.0 }
  0x55   :  { %83 = vst.msk [vmem:[#allocation2] sm:$0x1] %vm82_vm4, %v81_v54 }
  0x56   :  { %119 = shalt.err (!%p116_p4)
}
  0x57   :  { %s120_s23 = scalar_lea.hbm %s186_s3, 16 }
  0x58   :  { %p121_p5 = scmp.ne.s32.totalorder %s186_s3, %s120_s23  ;;  %p124_p6 = scmp.lt.u32.totalorder %s120_s23, %s186_s3 }
  0x5a   :  { %p126_p7 = pnand %p124_p6, %p121_p5 }
  0x5c   :  { %129 = shalt.err (!%p126_p7)
}
  0x5d   :  { %93 = dma.vmem_to_hbm [thread:$0]  %s91_s19, 16, %s186_s3, [#allocation3]  }
  0x5e   :  { %130 = dma.done.wait [#allocation3], 16  }
  0x5f   :  { %131 = vsyncadd [#allocation3], 4294967280 }
  0x60   :  { %97 = vsyncpa [#allocation3], 1 }

</bundles_post_ra>
